<compile_context>
chip_gen: v6e
topology: v6e:2x2x1
jax: 0.10.0
libtpu: 0.0.40
codegen_flags: <defaults>
</compile_context>

<pallas_src>
import functools
import math

import jax
import jax.numpy as jnp
from jax.experimental import pallas as pl
from jax.experimental.pallas import tpu as pltpu


# --------------------------- tiling / VMEM helpers -------------------------- #
_LANE = 128


def _round_up(n, m):
    return ((n + m - 1) // m) * m


def _round_down(n, m):
    return (n // m) * m


def _cdiv(a, b):
    return -(-a // b)


def _sublane_align(dtype):
    # Sub-32-bit dtypes pack along sublanes: 8 for f32, 16 for bf16, 32 for int8.
    return max(8, 32 // jnp.dtype(dtype).itemsize)


def _vmem_capacity_bytes():
    try:
        info = pltpu.get_tpu_info()
        cap = getattr(info, "vmem_capacity_bytes", None)
        if cap:
            return int(cap)
    except Exception:
        pass
    return 64 * 1024 * 1024  # conservative default (v7x per-TensorCore)


def _hw_budgets():
    """(per-block byte budget, scoped VMEM limit) for the current generation."""
    cap = _vmem_capacity_bytes()
    if cap >= 100 * 1024 * 1024:          # v5e / v6e: 128 MiB VMEM per core
        return 8 * 1024 * 1024, 64 * 1024 * 1024
    # v7x: 64 MiB per TensorCore -> smaller blocks and headroom below 64 MiB.
    return 4 * 1024 * 1024, 48 * 1024 * 1024


def _vmem_limit(in_block_bytes, out_block_bytes, cap):
    # 2x double-buffered in/out blocks + params + pipeline-internal headroom.
    need = 2 * (in_block_bytes + out_block_bytes) + (4 << 20)
    return int(min(cap, max(32 << 20, 2 * need)))


def _pick_tile(total, align, row_bytes, block_budget, other_steps):
    """Tile one axis: a multiple of `align` (or the whole axis if smaller).

    `row_bytes` is the padded byte cost per unit of this axis; the tile is
    sized against `block_budget`, then shrunk (never below `align`) so the
    *total* grid keeps >=2 (ideally >=4) steps for v7x's two TensorCores and
    for pipelining overlap -- without dropping below ~1 MiB blocks.
    """
    if total <= align:
        return total
    limit = max(align, _round_down(total, align))
    cap = max(align, _round_down(block_budget // max(1, row_bytes), align))
    tile = min(cap, limit)

    def steps(t):
        return other_steps * _cdiv(total, t)

    while tile > align and steps(tile) < 2:
        tile = max(align, _round_down(tile // 2, align))
    while tile > align and steps(tile) < 4 and tile * row_bytes > (1 << 20):
        tile = max(align, _round_down(tile // 2, align))
    return tile


# -------------------------------- kernels ----------------------------------- #
def _ln_sublane_reduce_kernel(x_ref, w_ref, b_ref, o_ref, *, eps, inv_c):
    # channels_first block: x (1, C, T) lane-dense on HW; reduce over C (sublanes).
    x = x_ref[...].astype(jnp.float32)
    s1 = jnp.sum(x, axis=-2, keepdims=True)
    s2 = jnp.sum(x * x, axis=-2, keepdims=True)
    mean = s1 * inv_c
    var = jnp.maximum(s2 * inv_c - mean * mean, 0.0)     # biased var, clamped
    # Per-position scale/shift (O(T) work), then two full-size ops + affine.
    scale = jax.lax.rsqrt(var + eps)
    shift = -mean * scale
    y = x * scale + shift
    w = w_ref[...].astype(jnp.float32)[None]             # (1, C, 1)
    b = b_ref[...].astype(jnp.float32)[None]
    o_ref[...] = (y * w + b).astype(o_ref.dtype)


def _ln_lane_reduce_kernel(x_ref, w_ref, b_ref, o_ref, *, eps, inv_c):
    # channels_last block: x (row_tile, C); reduce over C (lanes).
    x = x_ref[...].astype(jnp.float32)
    s1 = jnp.sum(x, axis=-1, keepdims=True)
    s2 = jnp.sum(x * x, axis=-1, keepdims=True)
    mean = s1 * inv_c
    var = jnp.maximum(s2 * inv_c - mean * mean, 0.0)
    scale = jax.lax.rsqrt(var + eps)                     # (row_tile, 1)
    shift = -mean * scale
    y = x * scale + shift
    w = w_ref[...].astype(jnp.float32)
    b = b_ref[...].astype(jnp.float32)
    o_ref[...] = (y * w + b).astype(o_ref.dtype)


def _ln_grouped_lane_kernel(x_ref, m_ref, w_ref, b_ref, o_ref, *, eps, inv_c, c):
    # channels_last with small C: block (row_tile, W0) where W0 = G*c packs G
    # whole normalization groups contiguously along the lane axis (free reshape
    # in the wrapper -> no host transpose, no extra HBM pass).  Per-group stats
    # are formed with c-1 lane rotations on the otherwise-idle XLU.
    x = x_ref[...].astype(jnp.float32)
    n = x.shape[-1]
    xx = x * x
    s1, s2 = x, xx
    for d in range(1, c):                                # s1[j] = sum_k x[j+k]
        s1 = s1 + pltpu.roll(x, n - d, 1)
        s2 = s2 + pltpu.roll(xx, n - d, 1)
    mean = s1 * inv_c                                    # valid at group starts
    var = jnp.maximum(s2 * inv_c - mean * mean, 0.0)
    scale = jax.lax.rsqrt(var + eps)
    shift = -mean * scale                                # folded affine part
    start = m_ref[...] > 0.5                             # (1, W0) group-start mask
    scale = jnp.where(start, scale, 0.0)
    shift = jnp.where(start, shift, 0.0)
    bscale, bshift = scale, shift
    for d in range(1, c):                                # broadcast start -> group
        bscale = bscale + pltpu.roll(scale, d, 1)
        bshift = bshift + pltpu.roll(shift, d, 1)
    y = x * bscale + bshift
    o_ref[...] = (y * w_ref[...] + b_ref[...]).astype(o_ref.dtype)


# ----------------------------- channels_first ------------------------------- #
def layernorm_channels_first(x, weight, bias, eps=1e-6):
    """x: (N, C, H, W); normalize over C per spatial position."""
    N, C, H, W = x.shape
    HW = H * W
    eb = x.dtype.itemsize
    block_budget, vmem_cap = _hw_budgets()

    x2 = x.reshape(N, C, HW)                             # free (contiguous)
    c_pad = _round_up(C, _sublane_align(x.dtype))        # padded sublane footprint
    # TODO(synk): for C < 8 a further win is packing 8//C samples per block to
    # fill the sublanes; left out to keep the (1, C, T) layout simple.
    tile_hw = _pick_tile(HW, _LANE, c_pad * eb, block_budget, other_steps=N)
    grid = (N, _cdiv(HW, tile_hw))
    blk_bytes = c_pad * tile_hw * eb

    w2 = weight.reshape(C, 1).astype(jnp.float32)
    b2 = bias.reshape(C, 1).astype(jnp.float32)

    out = pl.pallas_call(
        functools.partial(_ln_sublane_reduce_kernel, eps=eps, inv_c=1.0 / C),
        out_shape=jax.ShapeDtypeStruct((N, C, HW), x.dtype),
        grid_spec=pltpu.PrefetchScalarGridSpec(
            num_scalar_prefetch=0,
            grid=grid,
            in_specs=[
                pl.BlockSpec((1, C, tile_hw), lambda n, h: (n, 0, h)),
                pl.BlockSpec((C, 1), lambda n, h: (0, 0)),
                pl.BlockSpec((C, 1), lambda n, h: (0, 0)),
            ],
            out_specs=pl.BlockSpec((1, C, tile_hw), lambda n, h: (n, 0, h)),
        ),
        compiler_params=pltpu.CompilerParams(
            dimension_semantics=("parallel", "parallel"),
            vmem_limit_bytes=_vmem_limit(blk_bytes, blk_bytes, vmem_cap)),
    )(x2, w2, b2)
    return out.reshape(N, C, H, W)


# ------------------------------ channels_last ------------------------------- #
def _layernorm_cl_lane(x2, w, b, eps, C, block_budget, vmem_cap):
    rows = x2.shape[0]
    eb = x2.dtype.itemsize
    lane_pad = _round_up(C, _LANE)                       # padded lane footprint
    row_tile = _pick_tile(rows, _sublane_align(x2.dtype), lane_pad * eb,
                          block_budget, other_steps=1)
    grid = (_cdiv(rows, row_tile),)
    blk_bytes = row_tile * lane_pad * eb
    return pl.pallas_call(
        functools.partial(_ln_lane_reduce_kernel, eps=eps, inv_c=1.0 / C),
        out_shape=jax.ShapeDtypeStruct((rows, C), x2.dtype),
        grid_spec=pltpu.PrefetchScalarGridSpec(
            num_scalar_prefetch=0,
            grid=grid,
            in_specs=[
                pl.BlockSpec((row_tile, C), lambda i: (i, 0)),
                pl.BlockSpec((1, C), lambda i: (0, 0)),
                pl.BlockSpec((1, C), lambda i: (0, 0)),
            ],
            out_specs=pl.BlockSpec((row_tile, C), lambda i: (i, 0)),
        ),
        compiler_params=pltpu.CompilerParams(
            dimension_semantics=("parallel",),
            vmem_limit_bytes=_vmem_limit(blk_bytes, blk_bytes, vmem_cap)),
    )(x2, w.reshape(1, C), b.reshape(1, C))


def _layernorm_cl_grouped(x2, w, b, eps, C, G0, W0, block_budget, vmem_cap):
    rows = x2.shape[0]
    eb = x2.dtype.itemsize
    M = rows // G0
    xf = x2.reshape(M, W0)                               # free: groups packed on lanes
    mask = (jnp.arange(W0, dtype=jnp.int32) % C == 0).astype(jnp.float32).reshape(1, W0)
    wf = jnp.tile(w, G0).reshape(1, W0)                  # wf[j] = weight[j % C]
    bf = jnp.tile(b, G0).reshape(1, W0)

    row_tile = _pick_tile(M, _sublane_align(x2.dtype), W0 * eb,
                          block_budget, other_steps=1)
    grid = (_cdiv(M, row_tile),)
    blk_bytes = row_tile * W0 * eb

    out = pl.pallas_call(
        functools.partial(_ln_grouped_lane_kernel, eps=eps, inv_c=1.0 / C, c=C),
        out_shape=jax.ShapeDtypeStruct((M, W0), x2.dtype),
        grid_spec=pltpu.PrefetchScalarGridSpec(
            num_scalar_prefetch=0,
            grid=grid,
            in_specs=[
                pl.BlockSpec((row_tile, W0), lambda i: (i, 0)),
                pl.BlockSpec((1, W0), lambda i: (0, 0)),
                pl.BlockSpec((1, W0), lambda i: (0, 0)),
                pl.BlockSpec((1, W0), lambda i: (0, 0)),
            ],
            out_specs=pl.BlockSpec((row_tile, W0), lambda i: (i, 0)),
        ),
        compiler_params=pltpu.CompilerParams(
            dimension_semantics=("parallel",),
            vmem_limit_bytes=_vmem_limit(blk_bytes, blk_bytes, vmem_cap)),
    )(xf, mask, wf, bf)
    return out.reshape(rows, C)


def layernorm_channels_last(x, weight, bias, eps=1e-6):
    """x: (..., C); F.layer_norm over the last dim."""
    orig_shape = x.shape
    C = orig_shape[-1]
    rows = math.prod(orig_shape[:-1])
    block_budget, vmem_cap = _hw_budgets()

    x2 = x.reshape(rows, C)                              # free
    w = weight.reshape(-1).astype(jnp.float32)
    b = bias.reshape(-1).astype(jnp.float32)

    use_grouped = False
    G0 = W0 = 0
    if C < _LANE and C <= 16:
        G0 = _LANE // math.gcd(C, _LANE)
        W0 = C * G0                                      # lcm(C, 128)
        use_grouped = (rows % G0 == 0) and (W0 <= 2048)

    if use_grouped:
        out = _layernorm_cl_grouped(x2, w, b, eps, C, G0, W0, block_budget, vmem_cap)
    else:
        # Lane-reduce on (row_tile, C) blocks: single HBM read+write pass,
        # no host transpose / pad; lane density is just C/round_up(C,128).
        out = _layernorm_cl_lane(x2, w, b, eps, C, block_budget, vmem_cap)
    return out.reshape(orig_shape)


# ------------------------------- references --------------------------------- #
def _ref_channels_first(x, w, b, eps):
    mean = jnp.mean(x, axis=1, keepdims=True)
    var = jnp.mean((x - mean) ** 2, axis=1, keepdims=True)
    y = (x - mean) / jnp.sqrt(var + eps)
    return w[None, :, None, None] * y + b[None, :, None, None]


def _ref_channels_last(x, w, b, eps):
    mean = jnp.mean(x, axis=-1, keepdims=True)
    var = jnp.mean((x - mean) ** 2, axis=-1, keepdims=True)
    y = (x - mean) / jnp.sqrt(var + eps)
    return w * y + b


if __name__ == "__main__":
    key = jax.random.PRNGKey(0)
    eps = 1e-6
    N, C, H, W = 2, 4, 16, 16

    weight = jnp.ones((C,), jnp.float32) + 0.1 * jnp.arange(C, dtype=jnp.float32)
    bias = jnp.zeros((C,), jnp.float32) + 0.05 * jnp.arange(C, dtype=jnp.float32)

    k1, k2, k3, k4, k5 = jax.random.split(key, 5)

    # 1) channels_first (default data_format), NCHW input.
    x_cf = jax.random.normal(k1, (N, C, H, W), jnp.float32)
    out_cf = jax.block_until_ready(layernorm_channels_first(x_cf, weight, bias, eps))
    assert out_cf.shape == (N, C, H, W)
    assert jnp.allclose(out_cf, _ref_channels_first(x_cf, weight, bias, eps),
                        atol=1e-5, rtol=1e-5)

    # 2) channels_first with HW not a multiple of 128 -> ragged lane blocks.
    x_cf2 = jax.random.normal(k2, (2, C, 12, 12), jnp.float32)
    out_cf2 = jax.block_until_ready(layernorm_channels_first(x_cf2, weight, bias, eps))
    assert jnp.allclose(out_cf2, _ref_channels_first(x_cf2, weight, bias, eps),
                        atol=1e-5, rtol=1e-5)

    # 3) channels_last, small C -> grouped lane-dense path (no host transpose).
    x_cl = jax.random.normal(k3, (N, H, W, C), jnp.float32)
    out_cl = jax.block_until_ready(layernorm_channels_last(x_cl, weight, bias, eps))
    assert out_cl.shape == (N, H, W, C)
    assert jnp.allclose(out_cl, _ref_channels_last(x_cl, weight, bias, eps),
                        atol=1e-5, rtol=1e-5)

    # 4) channels_last, lane-wide C=128, rows not a multiple of 8 -> ragged rows.
    C2 = 128
    w2 = jnp.ones((C2,), jnp.float32) + 0.01 * jnp.arange(C2, dtype=jnp.float32)
    b2 = 0.02 * jnp.arange(C2, dtype=jnp.float32)
    x_cl2 = jax.random.normal(k4, (2, 11, C2), jnp.float32)
    out_cl2 = jax.block_until_ready(layernorm_channels_last(x_cl2, w2, b2, eps))
    assert out_cl2.shape == (2, 11, C2)
    assert jnp.allclose(out_cl2, _ref_channels_last(x_cl2, w2, b2, eps),
                        atol=1e-5, rtol=1e-5)

    # 5) channels_last, small C where rows don't divide the group packing
    #    -> direct (row_tile, C) fallback path.
    x_cl3 = jax.random.normal(k5, (3, 5, C), jnp.float32)
    out_cl3 = jax.block_until_ready(layernorm_channels_last(x_cl3, weight, bias, eps))
    assert out_cl3.shape == (3, 5, C)
    assert jnp.allclose(out_cl3, _ref_channels_last(x_cl3, weight, bias, eps),
                        atol=1e-5, rtol=1e-5)

    print("KERNEL_OK")
</pallas_src>

<mosaic_0001>
module attributes {stable_mosaic.version = 11 : i64} {
  func.func @_ln_sublane_reduce_kernel(%arg0: i32, %arg1: i32, %arg2: memref<1x4x256xf32, #tpu.memory_space<vmem>>, %arg3: memref<4x1xf32, #tpu.memory_space<vmem>>, %arg4: memref<4x1xf32, #tpu.memory_space<vmem>>, %arg5: memref<1x4x256xf32, #tpu.memory_space<vmem>>) attributes {dimension_semantics = [#tpu.dimension_semantics<parallel>, #tpu.dimension_semantics<parallel>], iteration_bounds = array<i64: 2, 1>, scalar_prefetch = 0 : i64, scratch_operands = 0 : i64, tpu.core_type = #tpu.core_type<tc>, window_params = [{transform_indices = @transform_0, window_bounds = array<i64: 1, 4, 256>}, {pipeline_mode = #tpu.pipeline_mode<synchronous>, transform_indices = @transform_1, window_bounds = array<i64: 4, 1>}, {pipeline_mode = #tpu.pipeline_mode<synchronous>, transform_indices = @transform_2, window_bounds = array<i64: 4, 1>}, {transform_indices = @transform_3, window_bounds = array<i64: 1, 4, 256>}]} {
    %c0 = arith.constant 0 : index
    %c0_0 = arith.constant 0 : index
    %c0_1 = arith.constant 0 : index
    %0 = vector.load %arg2[%c0, %c0_0, %c0_1] : memref<1x4x256xf32, #tpu.memory_space<vmem>>, vector<1x4x256xf32>
    %cst = arith.constant dense<0.000000e+00> : vector<1x256xf32>
    %1 = vector.multi_reduction <add>, %0, %cst [1] : vector<1x4x256xf32> to vector<1x256xf32>
    %2 = vector.shape_cast %1 : vector<1x256xf32> to vector<1x1x256xf32>
    %3 = arith.mulf %0, %0 : vector<1x4x256xf32>
    %cst_2 = arith.constant dense<0.000000e+00> : vector<1x256xf32>
    %4 = vector.multi_reduction <add>, %3, %cst_2 [1] : vector<1x4x256xf32> to vector<1x256xf32>
    %5 = vector.shape_cast %4 : vector<1x256xf32> to vector<1x1x256xf32>
    %cst_3 = arith.constant 2.500000e-01 : f32
    %6 = vector.broadcast %cst_3 : f32 to vector<1x1x256xf32>
    %7 = arith.mulf %2, %6 : vector<1x1x256xf32>
    %cst_4 = arith.constant 2.500000e-01 : f32
    %8 = vector.broadcast %cst_4 : f32 to vector<1x1x256xf32>
    %9 = arith.mulf %5, %8 : vector<1x1x256xf32>
    %10 = arith.mulf %7, %7 : vector<1x1x256xf32>
    %11 = arith.subf %9, %10 : vector<1x1x256xf32>
    %cst_5 = arith.constant 0.000000e+00 : f32
    %12 = vector.broadcast %cst_5 : f32 to vector<1x1x256xf32>
    %13 = arith.maximumf %11, %12 : vector<1x1x256xf32>
    %cst_6 = arith.constant 9.99999997E-7 : f32
    %14 = vector.broadcast %cst_6 : f32 to vector<1x1x256xf32>
    %15 = arith.addf %13, %14 : vector<1x1x256xf32>
    %16 = math.rsqrt %15 : vector<1x1x256xf32>
    %cst_7 = arith.constant 0.000000e+00 : f32
    %17 = vector.broadcast %cst_7 : f32 to vector<1x1x256xf32>
    %18 = arith.subf %17, %7 : vector<1x1x256xf32>
    %19 = arith.mulf %18, %16 : vector<1x1x256xf32>
    %20 = vector.broadcast %16 : vector<1x1x256xf32> to vector<1x4x256xf32>
    %21 = arith.mulf %0, %20 : vector<1x4x256xf32>
    %22 = vector.broadcast %19 : vector<1x1x256xf32> to vector<1x4x256xf32>
    %23 = arith.addf %21, %22 : vector<1x4x256xf32>
    %c0_8 = arith.constant 0 : index
    %c0_9 = arith.constant 0 : index
    %24 = vector.load %arg3[%c0_8, %c0_9] : memref<4x1xf32, #tpu.memory_space<vmem>>, vector<4x1xf32>
    %25 = vector.shape_cast %24 : vector<4x1xf32> to vector<1x4x1xf32>
    %c0_10 = arith.constant 0 : index
    %c0_11 = arith.constant 0 : index
    %26 = vector.load %arg4[%c0_10, %c0_11] : memref<4x1xf32, #tpu.memory_space<vmem>>, vector<4x1xf32>
    %27 = vector.shape_cast %26 : vector<4x1xf32> to vector<1x4x1xf32>
    %28 = vector.broadcast %25 : vector<1x4x1xf32> to vector<1x4x256xf32>
    %29 = arith.mulf %23, %28 : vector<1x4x256xf32>
    %30 = vector.broadcast %27 : vector<1x4x1xf32> to vector<1x4x256xf32>
    %31 = arith.addf %29, %30 : vector<1x4x256xf32>
    %c0_12 = arith.constant 0 : index
    %c0_13 = arith.constant 0 : index
    %c0_14 = arith.constant 0 : index
    %32 = vector.load %arg5[%c0_12, %c0_13, %c0_14] : memref<1x4x256xf32, #tpu.memory_space<vmem>>, vector<1x4x256xf32>
    tpu.vector_store %arg5[%c0_12, %c0_13, %c0_14], %31 {strides = array<i32>} : memref<1x4x256xf32, #tpu.memory_space<vmem>>, vector<1x4x256xf32>,
    return
  }
  func.func @transform_0(%arg0: i32, %arg1: i32) -> (i32, i32, i32) {
    %c0_i32 = arith.constant 0 : i32
    %c0_i32_0 = arith.constant 0 : i32
    return %arg0, %c0_i32, %arg1 : i32, i32, i32
  }
  func.func @transform_1(%arg0: i32, %arg1: i32) -> (i32, i32) {
    %c0_i32 = arith.constant 0 : i32
    %c0_i32_0 = arith.constant 0 : i32
    %c0_i32_1 = arith.constant 0 : i32
    return %c0_i32, %c0_i32_0 : i32, i32
  }
  func.func @transform_2(%arg0: i32, %arg1: i32) -> (i32, i32) {
    %c0_i32 = arith.constant 0 : i32
    %c0_i32_0 = arith.constant 0 : i32
    %c0_i32_1 = arith.constant 0 : i32
    return %c0_i32, %c0_i32_0 : i32, i32
  }
  func.func @transform_3(%arg0: i32, %arg1: i32) -> (i32, i32, i32) {
    %c0_i32 = arith.constant 0 : i32
    %c0_i32_0 = arith.constant 0 : i32
    return %arg0, %c0_i32, %arg1 : i32, i32, i32
  }
}

</mosaic_0001>

<bundles_post_ra>
// kernel: tpu_custom_call.1
= control target key start
LH: loop header
LB: loop body
LE: loop exit
PB: predicated region body
PF: predicated region fallthrough
CT: control target
= control target key end

     0   :  { %8 = vsyncpa [#allocation3], 0  ;;  %s767_s0 = inlined_call_operand.hbm [shape: f32[2,4,256], index: 0, kind: input, shape index: {}]   ;;  %s768_s1 = inlined_call_operand.vmem [shape: f32[4,1], index: 1, kind: input, shape index: {}]   ;;  %s769_s2 = inlined_call_operand.vmem [shape: f32[4,1], index: 2, kind: input, shape index: {}]   ;;  %s770_s3 = inlined_call_operand.hbm [shape: f32[2,4,256], index: 3, kind: output, shape index: {}]  }
   0x1   :  { %10 = vsyncpa [#allocation3 + $0x1], 0 }
   0x2   :  { %11 = vsyncpa [#allocation4], 0 }
   0x3   :  { %13 = vsyncpa [#allocation4 + $0x1], 0  ;;  %s623_s12 = smov 0   ;;  %s625_s13 = smov 0  }
   0x4   :  { %s627_s14 = smov 0   ;;  %s629_s15 = smov 0  }
   0x5   :  { %s631_s16 = smov 0   ;;  %s633_s17 = smov 0  }
   0x6 LB: > { %s402_s18 = sadd.s32 4294967295, %s597_s17   ;;  %s403_s19 = sadd.s32 4294967294, %s597_s17   ;;  %s597_s17 = sphi %s633_s17, %s19_s17   ;;  %s593_s16 = sphi %s631_s16, %s782_s16   ;;  %s589_s15 = sphi %s629_s15, %s781_s15   ;;  %s585_s14 = sphi %s627_s14, %s780_s14   ;;  %s581_s13 = sphi %s625_s13, %s779_s13   ;;  %s577_s12 = sphi %s623_s12, %s778_s12  }
   0x7   : > { %s31_s20 = sadd.s32 1, %s593_s16  ;;  %s40_s21 = sadd.s32 1, %s585_s14 }
   0x8   : > { %p33_p0 = scmp.ge.s32.totalorder %s31_s20, 2  ;;  %p47_p1 = scmp.ne.s32.totalorder %s585_s14, %s581_s13 }
   0x9   : > { %p48_p2 = scmp.eq.s32.totalorder %s597_s17, 0  ;;  %p53_p3 = scmp.ne.s32.totalorder %s581_s13, %s577_s12 }
   0xa   : > { %s784_s20 = smov (%p33_p0, %s31_s20), 0  ;;  %p54_p5 = scmp.eq.s32.totalorder %s402_s18, 0 }
   0xb   : > { %p664_p4 = por %p48_p2, %p47_p1  ;;  %s35_s23 = ssub.s32 %s593_s16, %s784_s20 }
   0xc   : > { %p121_p6 = scmp.eq.s32.totalorder %s402_s18, 1  ;;  %p38_p7 = scmp.eq.s32.totalorder %s35_s23, 0 }
   0xd   : > { %p670_p8 = por %p54_p5, %p53_p3  ;;  %p127_p10 = scmp.eq.s32.totalorder %s403_s19, 1 }
   0xe   : > { %p674_p9 = por %p121_p6, %p47_p1  ;;  %p431_p13 = scmp.lt.s32.totalorder %s597_s17, 2 }
   0xf   : > { %s679_s26 = scalar_select %p38_p7, %s585_s14, %s40_s21  }
  0x10   : > { %p681_p11 = por %p127_p10, %p53_p3  ;;  %s153_s28 = sand.u32 1, %s585_s14  }
  0x11   : > { %s406_s29 = sshll.u32 %s153_s28, 3  ;;  %s417_s30 = sshll.u32 %s593_s16, 7 }
  0x12   : > { %s774_s27 = scalar_select %p681_p11, 1, 0 }
  0x13   : > { %s165_s6 = scalar_lea.hbm %s767_s0, %s417_s30  ;;  %s157_s7 = scalar_lea.vmem [#allocation2], %s406_s29 }
  0x14   : > { %s167_s8 = sshll.u32 %s157_s7, 4  ;;  %p694_p0 = pnand %p431_p13, %p664_p4  ;;  %s168_s8 = int_to_ptr.vmem [resolvable:$true] %s167_s8 }
  0x15   : > { %p409_p1 = scmp.ge.s32.totalorder %s597_s17, 1  ;;  %p172_p2 = scmp.lt.s32.totalorder %s597_s17, 3 }
  0x16   : > { %s154_s10 = scalar_lea.sflag [#allocation3], %s153_s28  ;;  %p491_p3 = pneg %p694_p0 }
  0x17   : > { %s502_s11 = scalar_lea.vmem %s168_s8, 128  ;;  %s599_s18 = smov [#allocation2]  }
  0x18   : > { %p503_p5 = scmp.ne.s32.totalorder %s168_s8, %s502_s11  ;;  %s507_s19 = sshll.u32 %s599_s18, 4  ;;  %s508_s19 = int_to_ptr.vmem [resolvable:$false] %s507_s19 }
  0x19   : > { %s509_s21 = scalar_lea.vmem %s508_s19, 256  ;;  %p510_p10 = scmp.lt.s32.totalorder %s168_s8, %s508_s19 }
  0x1a   : > { %p505_p6 = pnand %p503_p5, %p491_p3  ;;  %p511_p12 = scmp.lt.s32.totalorder %s509_s21, %s502_s11 }
  0x1c   : > { %p506_p7 = pneg %p505_p6  ;;  %p512_p4 = por %p511_p12, %p510_p10 }
  0x1e   : > { %p513_p13 = pnand %p512_p4, %p506_p7 }
  0x20   : > { %516 = shalt.err (!%p513_p13)
}
  0x21   : > { %426 = dma.hbm_to_vmem [thread:$0]  (!%p694_p0), %s165_s6, 128, %s168_s8, %s154_s10  }
  0x22   : > { %p173_p11 = pnand %p409_p1, %p172_p2 }
  0x23   : > { %s709_s22 = sand.u32 (!%p173_p11), 1, %s581_s13  }
  0x24   : > { %176 = sbr.rel (%p173_p11) target bundleno = 189 (0xbd), region = 32  ;;  %s410_s23 = sshll.u32 (!%p173_p11), %s709_s22, 3 }
  0x25   : > { %s179_s28 = scalar_lea.sflag (!%p173_p11), [#allocation3], %s709_s22  ;;  %s182_s29 = scalar_lea.vmem (!%p173_p11), [#allocation2], %s410_s23 }
  0x29   : > { %568 = dma.done.wait (%p670_p8), %s179_s28, 128  }
  0x2a   : > { %570 = vsyncadd (%p670_p8), %s179_s28, 4294967168  ;;  %v600_v0 = vmov 0   ;;  %v272_v1 = vld [vmem:[%s768_s1] sm:$0xf]  ;;  %vm211_vm0 = vcmask 1043456   ;;  %v281_v47 = vlaneseq  ;;  %s418_s24 = sshll.u32 %s589_s15, 7 }
  0x2b   : > { %483 = vset.pattern.permute.xlu0 %v600_v0  ;;  %v273_v2 = vld [vmem:[%s769_s2] sm:$0xf]  ;;  %v601_v49 = vmov 839922192   ;;  %s204_s7 = scalar_lea.vmem [#allocation5], %s410_s23  ;;  %s316_s11 = scalar_lea.hbm %s770_s3, %s418_s24 }
  0x2c   : > { %276 = vperm.xlu0 %483, %v272_v1   ;;  %v207_v3 = vld [vmem:[%s182_s29] sm:$0xff]  ;;  %v279_v50 = vunpack.c.l.s4 %v601_v49  ;;  %v282_v54 = vshrl.u32 %v281_v47, 7  ;;  %s318_s8 = sshll.u32 %s204_s7, 4  ;;  %s302_s18 = scalar_lea.sflag [#allocation4], %s709_s22  ;;  %s319_s8 = int_to_ptr.vmem [resolvable:$true] %s318_s8 }
  0x2d   : > { %v209_v4 = vcombine.high %v207_v3, %v207_v3  ;;  %v226_v5 = vmul.f32 %v207_v3, %v207_v3  ;;  %v212_v6 = vsel %vm211_vm0, %v207_v3, 0.0  ;;  %s517_s19 = scalar_lea.vmem %s319_s8, 128  ;;  %s602_s21 = smov [#allocation5]  }
  0x2e   : > { %v213_v9 = vrot.slane %v212_v6, 4  ;;  %v280_v55 = vunpack.c.0.s8 %v279_v50  ;;  %p518_p8 = scmp.ne.s32.totalorder %s319_s8, %s517_s19  ;;  %s521_s15 = sshll.u32 %s602_s21, 4  ;;  %s522_s15 = int_to_ptr.vmem [resolvable:$false] %s521_s15 }
  0x2f   : > { %v219_v7 = vsel %vm211_vm0, %v209_v4, 0.0  ;;  %v228_v8 = vcombine.high %v226_v5, %v226_v5  ;;  %v230_v11 = vsel %vm211_vm0, %v226_v5, 0.0  ;;  %s523_s23 = scalar_lea.vmem %s522_s15, 256  ;;  %p524_p0 = scmp.lt.s32.totalorder %s319_s8, %s522_s15 }
  0x30   : > { %289 = vperm.xlu0 %483, %v273_v2   ;;  %v220_v10 = vrot.slane %v219_v7, 4  ;;  %v214_v13 = vadd.f32 %v213_v9, %v212_v6  ;;  %v231_v14 = vrot.slane %v230_v11, 4  ;;  %v283_v59 = vsub.s32 %v280_v55, %v282_v54  ;;  %p519_p11 = pnand %p518_p8, %p674_p9  ;;  %p525_p1 = scmp.lt.s32.totalorder %s523_s23, %s517_s19 }
  0x31   : > { %v237_v12 = vsel %vm211_vm0, %v228_v8, 0.0 }
  0x32   : > { %v221_v15 = vadd.f32 %v220_v10, %v219_v7  ;;  %v238_v16 = vrot.slane %v237_v12, 4  ;;  %v215_v17 = vrot.slane %v214_v13, 2  ;;  %v232_v18 = vadd.f32 %v231_v14, %v230_v11  ;;  %p520_p12 = pneg %p519_p11  ;;  %p526_p2 = por %p525_p1, %p524_p0 }
  0x34   : > { %v222_v19 = vrot.slane %v221_v15, 2  ;;  %v239_v20 = vadd.f32 %v238_v16, %v237_v12  ;;  %v216_v21 = vadd.f32 %v215_v17, %v214_v13  ;;  %v233_v22 = vrot.slane %v232_v18, 2  ;;  %p527_p3 = pnand %p526_p2, %p520_p12 }
  0x36   : > { %v223_v23 = vadd.f32 %v222_v19, %v221_v15  ;;  %v240_v24 = vrot.slane %v239_v20, 2  ;;  %v217_v25 = vrot.slane %v216_v21, 1  ;;  %v234_v26 = vadd.f32 %v233_v22, %v232_v18 }
  0x38   : > { %v224_v27 = vrot.slane %v223_v23, 1  ;;  %v241_v28 = vadd.f32 %v240_v24, %v239_v20  ;;  %v218_v29 = vadd.f32 %v217_v25, %v216_v21  ;;  %v235_v30 = vrot.slane %v234_v26, 1 }
  0x3a   : > { %v225_v31 = vadd.f32 %v224_v27, %v223_v23  ;;  %v242_v32 = vrot.slane %v241_v28, 1  ;;  %v236_v33 = vadd.f32 %v235_v30, %v234_v26  ;;  %v244_v34 = vmul.f32 0.25, %v218_v29 }
  0x3c   : > { %v243_v35 = vadd.f32 %v242_v32, %v241_v28  ;;  %v245_v36 = vmul.f32 0.25, %v225_v31  ;;  %v246_v37 = vmul.f32 0.25, %v236_v33  ;;  %v248_v38 = vmul.f32 %v244_v34, %v244_v34 }
  0x3d   : > { %v258_v51 = vsub.f32 0.0, %v244_v34 }
  0x3e   : > { %v247_v39 = vmul.f32 0.25, %v243_v35  ;;  %v249_v40 = vmul.f32 %v245_v36, %v245_v36  ;;  %v250_v41 = vsub.f32 %v246_v37, %v248_v38  ;;  %v259_v52 = vsub.f32 0.0, %v245_v36 }
  0x40   : > { %v251_v42 = vsub.f32 %v247_v39, %v249_v40  ;;  %v252_v43 = vmax.f32 %v250_v41, 0.0 }
  0x42   : > { %v253_v44 = vmax.f32 %v251_v42, 0.0  ;;  %v254_v45 = vadd.f32 1e-06, %v252_v43 }
  0x44   : > { %v255_v46 = vadd.f32 1e-06, %v253_v44  ;;  %485 = vrsqrt.f32 %v254_v45 }
  0x46   : > { %487 = vrsqrt.f32 %v255_v46 }
  0x51   : > { %v486_v48 = vpop.eup %485 }
  0x52   : > { %v260_v56 = vmul.f32 %v486_v48, %v258_v51 }
  0x53   : > { %v488_v53 = vpop.eup %487 }
  0x54   : > { %v261_v57 = vmul.f32 %v488_v53, %v259_v52  ;;  %v264_v58 = vcombine.low %v486_v48, %v488_v53 }
  0x56   : > { %v266_v60 = vmul.f32 %v264_v58, %v207_v3  ;;  %v269_v61 = vcombine.low %v260_v56, %v261_v57 }
  0x58   : > { %v271_v63 = vadd.f32 %v269_v61, %v266_v60 }
  0xa7   : > { %v277_v62 = vpop.permute.xlu0 %276 }
  0xa8   : > { %v284_v0 = vrot.slane %v277_v62, %v283_v59 }
  0xaa   : > { %v286_v2 = vmul.f32 %v284_v0, %v271_v63 }
  0xab   : > { %v290_v1 = vpop.permute.xlu0 %289 }
  0xac   : > { %v297_v4 = vrot.slane %v290_v1, %v283_v59 }
  0xae   : > { %v299_v5 = vadd.f32 %v297_v4, %v286_v2 }
  0xb0   : > { %300 = vst [vmem:[%s204_s7] sm:$0xff] %v299_v5 }
  0xb1   : > { %530 = shalt.err (!%p527_p3)
}
  0xb2   : > { %s531_s28 = scalar_lea.hbm %s316_s11, 128  ;;  %s535_s30 = scalar_lea.hbm %s770_s3, 256 }
  0xb3   : > { %p532_p5 = scmp.ne.s32.totalorder %s316_s11, %s531_s28  ;;  %p536_p10 = scmp.lt.s32.totalorder %s316_s11, %s770_s3 }
  0xb4   : > { %p537_p4 = scmp.lt.s32.totalorder %s535_s30, %s531_s28 }
  0xb5   : > { %p533_p6 = pnand %p532_p5, %p674_p9 }
  0xb6   : > { %p538_p13 = por %p537_p4, %p536_p10 }
  0xb7   : > { %p534_p7 = pneg %p533_p6 }
  0xb9   : > { %p539_p8 = pnand %p538_p13, %p534_p7 }
  0xbb   : > { %542 = shalt.err (!%p539_p8)
}
  0xbc   : > { %421 = dma.vmem_to_hbm [thread:$0]  (%p674_p9), %s319_s8, 128, %s316_s11, %s302_s18  }
  0xbd PF: > { %s330_s6 = sand.u32 1, %s577_s12   ;;  %p776_p11 = scmp.ne.s32.totalorder %s774_s27, 0 }
  0xbe   : > { %p777_p12 = scmp.ge.s32.totalorder %s597_s17, 2  ;;  %s331_s24 = scalar_lea.sflag [#allocation4], %s330_s6 }
  0xc0   : > { %p428_p0 = pnand %p777_p12, %p776_p11 }
  0xc2   : > { %p429_p1 = pneg %p428_p0 }
  0xc4   : > { %572 = dma.done.wait (%p429_p1), %s331_s24, 128  }
  0xc5   : > { %574 = vsyncadd (%p429_p1), %s331_s24, 4294967168  ;;  %s19_s17 = sadd.s32 1, %s597_s17   ;;  %s778_s12 = smov %s581_s13 }
  0xc6   : > { %p16_p2 = scmp.ge.s32.totalorder %s19_s17, 4   ;;  %s779_s13 = smov %s585_s14 }
  0xc7   : > { %s780_s14 = smov %s679_s26  ;;  %s781_s15 = smov %s593_s16 }
  0xc8   : > { %s782_s16 = smov %s784_s20  ;;  %18 = sbr.rel (!%p16_p2) target bundleno = 6 (0x6), region = 77 }
  0xcd   :  { %336 = vsyncpa [#allocation3], 1 }
  0xce   :  { %338 = vsyncpa [#allocation3 + $0x1], 1 }
  0xcf   :  { %339 = vsyncpa [#allocation4], 1 }
  0xd0   :  { %341 = vsyncpa [#allocation4 + $0x1], 1 }

</bundles_post_ra>
